<compile_context>
chip_gen: v5e
topology: v5e:2x2
jax: 0.10.0
libtpu: 0.0.40
codegen_flags: <defaults>
</compile_context>

<pallas_src>
import functools

import jax
import jax.numpy as jnp
from jax.experimental import pallas as pl
from jax.experimental.pallas import tpu as pltpu


def _round_up(n, m):
    return ((n + m - 1) // m) * m


def _fused_mlp_kernel(*refs, n_layers):
    """refs = (x_ref, w1_ref, b1_ref, ..., wn_ref, bn_ref, o_ref).

    x_ref : (TILE_B, num_steps)   f32 activations (batch on sublanes)
    wi_ref: (in_i, out_i)         bf16, transposed; only the LAST layer's
                                  out dim is zero-padded to a multiple of 128
    bi_ref: (1, out_i)            f32
    o_ref : (TILE_B, out_pad)     f32, 128-lane-dense store
    Intermediates stay in vregs; only the final layer output is stored.
    """
    x_ref = refs[0]
    o_ref = refs[-1]

    h = x_ref[...]
    for li in range(n_layers):
        w_ref = refs[1 + 2 * li]
        b_ref = refs[2 + 2 * li]
        # bf16 x bf16 matmul, fp32 accumulate on the MXU.
        h = jnp.dot(h.astype(w_ref.dtype), w_ref[...],
                    preferred_element_type=jnp.float32)
        h = h + b_ref[...]                        # f32 bias, broadcast over batch
        if li != n_layers - 1:
            h = jnp.maximum(h, 0.0)               # ReLU on all but last layer
    o_ref[...] = h.astype(o_ref.dtype)


def fused_mlp(x, padded_params, out_pad_last, *, tile_b=512):
    """Single fused-MLP pallas_call, batch-tiled with resident weights."""
    B, in0 = x.shape
    n = len(padded_params)

    flat = []
    for w_t, b_p in padded_params:
        flat.append(w_t)
        flat.append(b_p)

    # Batch tile: full B when small (block == full dim is always legal),
    # otherwise 512 rows (multiple of 8 sublanes; ~0.35us/step amortized,
    # per-tile activation buffers stay well under 1 MiB).
    tb = B if B <= tile_b else tile_b
    grid = (pl.cdiv(B, tb),)

    in_specs = [pl.BlockSpec((tb, in0), lambda i: (i, 0))]
    for w_t, b_p in padded_params:
        # Constant index_map: weights/biases DMA'd once, resident across tiles.
        in_specs.append(pl.BlockSpec(w_t.shape, lambda i: (0, 0)))
        in_specs.append(pl.BlockSpec(b_p.shape, lambda i: (0, 0)))
    out_specs = pl.BlockSpec((tb, out_pad_last), lambda i: (i, 0))

    kernel = functools.partial(_fused_mlp_kernel, n_layers=n)
    return pl.pallas_call(
        kernel,
        out_shape=jax.ShapeDtypeStruct((B, out_pad_last), jnp.float32),
        grid=grid,
        in_specs=in_specs,
        out_specs=out_specs,
        compiler_params=pltpu.CompilerParams(
            dimension_semantics=("parallel",)),   # v7x: shard tiles over 2 TCs
    )(x, *flat)


class TaskPoolReluHeadPallas:
    """JAX/Pallas re-implementation of TaskPoolReluHead.forward."""

    def __init__(self, num_steps, num_tasks, middle_layers, init_std=0.001,
                 key=None):
        self.layers = [num_steps] + list(middle_layers) + [num_tasks]
        self.num_tasks = num_tasks
        self.init_std = init_std
        key = jax.random.PRNGKey(42) if key is None else key

        # PyTorch-layout parameters (weight [out, in], bias [out]) — kept as
        # the fp32 reference; init_weights(): weight ~ N(0, init_std), bias 0.
        self.params = []
        for in_size, out_size in zip(self.layers[:-1], self.layers[1:]):
            key, wk = jax.random.split(key)
            w = (jax.random.normal(wk, (out_size, in_size), jnp.float32)
                 * init_std)
            b = jnp.zeros((out_size,), jnp.float32)
            self.params.append((w, b))

        # Precompute ONCE: transposed [in, out] weights in bf16; biases [1,out]
        # in f32. Only the LAST layer's output dim is zero-padded to 128 (so
        # the HBM store is lane-dense). Zero padding is exact: padded output
        # lanes get zero weight columns + zero bias.
        self.padded_params = []
        n = len(self.params)
        for li, (w, b) in enumerate(self.params):
            out_size, in_size = w.shape
            out_pad = _round_up(out_size, 128) if li == n - 1 else out_size
            w_t = jnp.zeros((in_size, out_pad), jnp.float32)
            w_t = w_t.at[:, :out_size].set(w.T)
            w_t = w_t.astype(jnp.bfloat16)            # cast once, not per call
            b_p = jnp.zeros((1, out_pad), jnp.float32)
            b_p = b_p.at[0, :out_size].set(b)
            self.padded_params.append((w_t, b_p))
        self.out_pad_last = _round_up(num_tasks, 128)

    def __call__(self, step_scores):
        out = fused_mlp(step_scores, self.padded_params, self.out_pad_last)
        # NOTE: at large B, downstream consumers should take the padded
        # (B, out_pad_last) output directly (or fuse this slice) to avoid an
        # extra output-sized HBM pass; kept here for exact module semantics.
        return out[:, : self.num_tasks]


def _reference_forward(params, x):
    scores = x
    n = len(params)
    for li, (w, b) in enumerate(params):
        scores = scores @ w.T + b
        if li != n - 1:
            scores = jnp.maximum(scores, 0.0)
    return scores


if __name__ == "__main__":
    # Small shapes consistent with the module: num_steps inputs -> middle
    # layers -> num_tasks outputs. init_std chosen so outputs have a sane
    # scale for the bf16-vs-fp32 comparison.
    batch, num_steps, num_tasks = 8, 32, 16
    middle_layers = [64, 48]

    head = TaskPoolReluHeadPallas(num_steps, num_tasks, middle_layers,
                                  init_std=0.02,
                                  key=jax.random.PRNGKey(1))

    x = jax.random.normal(jax.random.PRNGKey(0), (batch, num_steps),
                          jnp.float32)

    out = head(x)
    out = jax.block_until_ready(out)

    ref = _reference_forward(head.params, x)
    assert out.shape == (batch, num_tasks), out.shape
    # bf16 weights/activations on the MXU, fp32 accumulate: compare with a
    # relative tolerance instead of the old 1e-5 fp32 tolerance.
    err = float(jnp.max(jnp.abs(out - ref)))
    tol = 2e-2 * float(jnp.max(jnp.abs(ref))) + 1e-6
    assert err <= tol, (err, tol)

    # TODO(synk): TaskPoolReluHead.loss (cross-entropy) is training-only and
    # not part of forward(); left to standard JAX if ever needed.
    print("KERNEL_OK")
</pallas_src>

<mosaic_0001>
module attributes {stable_mosaic.version = 11 : i64} {
  func.func @_fused_mlp_kernel(%arg0: i32, %arg1: memref<8x32xf32, #tpu.memory_space<vmem>>, %arg2: memref<32x64xbf16, #tpu.memory_space<vmem>>, %arg3: memref<1x64xf32, #tpu.memory_space<vmem>>, %arg4: memref<64x48xbf16, #tpu.memory_space<vmem>>, %arg5: memref<1x48xf32, #tpu.memory_space<vmem>>, %arg6: memref<48x128xbf16, #tpu.memory_space<vmem>>, %arg7: memref<1x128xf32, #tpu.memory_space<vmem>>, %arg8: memref<8x128xf32, #tpu.memory_space<vmem>>) attributes {dimension_semantics = [#tpu.dimension_semantics<parallel>], iteration_bounds = array<i64: 1>, scalar_prefetch = 0 : i64, scratch_operands = 0 : i64, tpu.core_type = #tpu.core_type<tc>, window_params = [{transform_indices = @transform_0, window_bounds = array<i64: 8, 32>}, {pipeline_mode = #tpu.pipeline_mode<synchronous>, transform_indices = @transform_1, window_bounds = array<i64: 32, 64>}, {pipeline_mode = #tpu.pipeline_mode<synchronous>, transform_indices = @transform_2, window_bounds = array<i64: 1, 64>}, {pipeline_mode = #tpu.pipeline_mode<synchronous>, transform_indices = @transform_3, window_bounds = array<i64: 64, 48>}, {pipeline_mode = #tpu.pipeline_mode<synchronous>, transform_indices = @transform_4, window_bounds = array<i64: 1, 48>}, {pipeline_mode = #tpu.pipeline_mode<synchronous>, transform_indices = @transform_5, window_bounds = array<i64: 48, 128>}, {pipeline_mode = #tpu.pipeline_mode<synchronous>, transform_indices = @transform_6, window_bounds = array<i64: 1, 128>}, {transform_indices = @transform_7, window_bounds = array<i64: 8, 128>}]} {
    %c0 = arith.constant 0 : index
    %c0_0 = arith.constant 0 : index
    %0 = vector.load %arg1[%c0, %c0_0] : memref<8x32xf32, #tpu.memory_space<vmem>>, vector<8x32xf32>
    %1 = arith.truncf %0 : vector<8x32xf32> to vector<8x32xbf16>
    %c0_1 = arith.constant 0 : index
    %c0_2 = arith.constant 0 : index
    %2 = vector.load %arg2[%c0_1, %c0_2] : memref<32x64xbf16, #tpu.memory_space<vmem>>, vector<32x64xbf16>
    %cst = arith.constant dense<0.000000e+00> : vector<8x64xf32>
    %3 = tpu.matmul %1, %2, %cst {dimension_numbers = #tpu.dot_dimension_numbers<[1], [0], [0], [1], [0, 0, 1, 1], [], []>} : vector<8x32xbf16>, vector<32x64xbf16>, vector<8x64xf32> -> vector<8x64xf32>
    %c0_3 = arith.constant 0 : index
    %c0_4 = arith.constant 0 : index
    %4 = vector.load %arg3[%c0_3, %c0_4] : memref<1x64xf32, #tpu.memory_space<vmem>>, vector<1x64xf32>
    %5 = vector.broadcast %4 : vector<1x64xf32> to vector<8x64xf32>
    %6 = arith.addf %3, %5 : vector<8x64xf32>
    %cst_5 = arith.constant 0.000000e+00 : f32
    %7 = vector.broadcast %cst_5 : f32 to vector<8x64xf32>
    %8 = arith.maximumf %6, %7 : vector<8x64xf32>
    %9 = arith.truncf %8 : vector<8x64xf32> to vector<8x64xbf16>
    %c0_6 = arith.constant 0 : index
    %c0_7 = arith.constant 0 : index
    %10 = vector.load %arg4[%c0_6, %c0_7] : memref<64x48xbf16, #tpu.memory_space<vmem>>, vector<64x48xbf16>
    %cst_8 = arith.constant dense<0.000000e+00> : vector<8x48xf32>
    %11 = tpu.matmul %9, %10, %cst_8 {dimension_numbers = #tpu.dot_dimension_numbers<[1], [0], [0], [1], [0, 0, 1, 1], [], []>} : vector<8x64xbf16>, vector<64x48xbf16>, vector<8x48xf32> -> vector<8x48xf32>
    %c0_9 = arith.constant 0 : index
    %c0_10 = arith.constant 0 : index
    %12 = vector.load %arg5[%c0_9, %c0_10] : memref<1x48xf32, #tpu.memory_space<vmem>>, vector<1x48xf32>
    %13 = vector.broadcast %12 : vector<1x48xf32> to vector<8x48xf32>
    %14 = arith.addf %11, %13 : vector<8x48xf32>
    %cst_11 = arith.constant 0.000000e+00 : f32
    %15 = vector.broadcast %cst_11 : f32 to vector<8x48xf32>
    %16 = arith.maximumf %14, %15 : vector<8x48xf32>
    %17 = arith.truncf %16 : vector<8x48xf32> to vector<8x48xbf16>
    %c0_12 = arith.constant 0 : index
    %c0_13 = arith.constant 0 : index
    %18 = vector.load %arg6[%c0_12, %c0_13] : memref<48x128xbf16, #tpu.memory_space<vmem>>, vector<48x128xbf16>
    %cst_14 = arith.constant dense<0.000000e+00> : vector<8x128xf32>
    %19 = tpu.matmul %17, %18, %cst_14 {dimension_numbers = #tpu.dot_dimension_numbers<[1], [0], [0], [1], [0, 0, 1, 1], [], []>} : vector<8x48xbf16>, vector<48x128xbf16>, vector<8x128xf32> -> vector<8x128xf32>
    %c0_15 = arith.constant 0 : index
    %c0_16 = arith.constant 0 : index
    %20 = vector.load %arg7[%c0_15, %c0_16] : memref<1x128xf32, #tpu.memory_space<vmem>>, vector<1x128xf32>
    %21 = vector.broadcast %20 : vector<1x128xf32> to vector<8x128xf32>
    %22 = arith.addf %19, %21 : vector<8x128xf32>
    %c0_17 = arith.constant 0 : index
    %c0_18 = arith.constant 0 : index
    %23 = vector.load %arg8[%c0_17, %c0_18] : memref<8x128xf32, #tpu.memory_space<vmem>>, vector<8x128xf32>
    tpu.vector_store %arg8[%c0_17, %c0_18], %22 {strides = array<i32>} : memref<8x128xf32, #tpu.memory_space<vmem>>, vector<8x128xf32>,
    return
  }
  func.func @transform_0(%arg0: i32) -> (i32, i32) {
    %c0_i32 = arith.constant 0 : i32
    %c0_i32_0 = arith.constant 0 : i32
    return %arg0, %c0_i32 : i32, i32
  }
  func.func @transform_1(%arg0: i32) -> (i32, i32) {
    %c0_i32 = arith.constant 0 : i32
    %c0_i32_0 = arith.constant 0 : i32
    %c0_i32_1 = arith.constant 0 : i32
    return %c0_i32, %c0_i32_0 : i32, i32
  }
  func.func @transform_2(%arg0: i32) -> (i32, i32) {
    %c0_i32 = arith.constant 0 : i32
    %c0_i32_0 = arith.constant 0 : i32
    %c0_i32_1 = arith.constant 0 : i32
    return %c0_i32, %c0_i32_0 : i32, i32
  }
  func.func @transform_3(%arg0: i32) -> (i32, i32) {
    %c0_i32 = arith.constant 0 : i32
    %c0_i32_0 = arith.constant 0 : i32
    %c0_i32_1 = arith.constant 0 : i32
    return %c0_i32, %c0_i32_0 : i32, i32
  }
  func.func @transform_4(%arg0: i32) -> (i32, i32) {
    %c0_i32 = arith.constant 0 : i32
    %c0_i32_0 = arith.constant 0 : i32
    %c0_i32_1 = arith.constant 0 : i32
    return %c0_i32, %c0_i32_0 : i32, i32
  }
  func.func @transform_5(%arg0: i32) -> (i32, i32) {
    %c0_i32 = arith.constant 0 : i32
    %c0_i32_0 = arith.constant 0 : i32
    %c0_i32_1 = arith.constant 0 : i32
    return %c0_i32, %c0_i32_0 : i32, i32
  }
  func.func @transform_6(%arg0: i32) -> (i32, i32) {
    %c0_i32 = arith.constant 0 : i32
    %c0_i32_0 = arith.constant 0 : i32
    %c0_i32_1 = arith.constant 0 : i32
    return %c0_i32, %c0_i32_0 : i32, i32
  }
  func.func @transform_7(%arg0: i32) -> (i32, i32) {
    %c0_i32 = arith.constant 0 : i32
    %c0_i32_0 = arith.constant 0 : i32
    return %arg0, %c0_i32 : i32, i32
  }
}

</mosaic_0001>

<bundles_post_ra>
// kernel: tpu_custom_call.1
= control target key start
LH: loop header
LB: loop body
LE: loop exit
PB: predicated region body
PF: predicated region fallthrough
CT: control target
= control target key end

     0   :  { %s347_s0 = inlined_call_operand.vmem [shape: f32[8,32], index: 0, kind: input, shape index: {}]   ;;  %s348_s1 = inlined_call_operand.vmem [shape: bf16[32,64], index: 1, kind: input, shape index: {}]   ;;  %s349_s2 = inlined_call_operand.vmem [shape: f32[1,64], index: 2, kind: input, shape index: {}]   ;;  %s350_s3 = inlined_call_operand.vmem [shape: bf16[64,48], index: 3, kind: input, shape index: {}]   ;;  %s351_s4 = inlined_call_operand.vmem [shape: f32[1,48], index: 4, kind: input, shape index: {}]   ;;  %s352_s5 = inlined_call_operand.vmem [shape: bf16[48,128], index: 5, kind: input, shape index: {}]   ;;  %s353_s6 = inlined_call_operand.vmem [shape: f32[1,128], index: 6, kind: input, shape index: {}]   ;;  %s354_s7 = inlined_call_operand.hbm [shape: f32[8,128], index: 7, kind: output, shape index: {}]  }
   0x1   :  { %v226_v0 = vld [vmem:[%s348_s1 + $0x8] sm:$0xff]  ;;  %v225_v1 = vld [vmem:[%s348_s1] sm:$0xff]  ;;  %v230_v2 = vld [vmem:[%s350_s3 + $0x18] sm:$0xff] }
   0x2   :  { %60 = vmatpush.bf16.msra.mxu0 %v226_v0  ;;  %v28_v3 = vld [vmem:[%s347_s0] sm:$0xff]  ;;  %113 = vmatpush.bf16.msra.mxu1 %v230_v2  ;;  %v229_v4 = vld [vmem:[%s350_s3 + $0x10] sm:$0xff] }
   0x3   :  { %12 = vsyncpa [#allocation3], 0  ;;  %v29_v5 = vpack.c.bf16 %v28_v3, %v28_v3  ;;  %vm50_vm0 = vcmask 261120   ;;  %v228_v6 = vld [vmem:[%s350_s3 + $0x8] sm:$0xff]  ;;  %v227_v7 = vld [vmem:[%s350_s3] sm:$0xff]  ;;  %vm105_vm1 = vcmask 523264  }
   0x4   :  { %v233_v8 = vld [vmem:[%s352_s5 + $0x10] sm:$0xff]  ;;  %v235_v9 = vld [vmem:[%s349_s2] ss:$0 sm:$0xff]  ;;  %v232_v15 = vld [vmem:[%s352_s5 + $0x8] sm:$0xff]  ;;  %vm152_vm2 = vcmask 392192   ;;  %s264_s23 = smov [#allocation2]  }
   0x5   :  { %161 = vmatpush.bf16.msra.mxu2 %v233_v8  ;;  %v231_v16 = vld [vmem:[%s352_s5] sm:$0xff]  ;;  %s175_s24 = sshll.u32 %s264_s23, 4  ;;  %s177_s26 = sshll.u32 %s354_s7, 4  ;;  %s176_s24 = int_to_ptr.vmem [resolvable:$true] %s175_s24  ;;  %s178_s26 = int_to_ptr.hbm [resolvable:$true] %s177_s26 }
   0x6   :  { %61 = vmatpush.bf16.msra.mxu0 %v225_v1  ;;  %114 = vmatpush.bf16.msra.mxu1 %v229_v4  ;;  %v236_v17 = vld [vmem:[%s351_s4] ss:$0 sm:$0xff] }
   0x7   :  { %v237_v23 = vld [vmem:[%s353_s6] ss:$0 sm:$0xff] }
   0x9   :  { %194 = vmatmul.msk.bf16.vlgmr.msra.gmra.mxu0 %vm50_vm0, %v29_v5  ;;  %162 = vmatpush.bf16.msra.mxu2 %v232_v15 }
   0xa   :  { %115 = vmatpush.bf16.msra.mxu1 %v228_v6 }
   0xd   :  { %163 = vmatpush.bf16.msra.mxu2 %v231_v16 }
   0xe   :  { %116 = vmatpush.bf16.msra.mxu1 %v227_v7 }
  0x86   :  { %v63_v10 = vpop.f32.mrf.mxu0 }
  0x87   :  { %v64_v11 = vadd.f32 %v235_v9, %v63_v10 }
  0x89   :  { %v67_v12 = vmax.f32 %v64_v11, 0.0 }
  0x8b   :  { %v68_v13 = vpack.c.bf16 %v67_v12, %v67_v12 }
  0x8d   :  { %211 = vmatmul.msk.bf16.vlgmr.msra.gmra.mxu1 %vm105_vm1, %v68_v13 }
  0x8e   :  { %v65_v14 = vpop.f32.mrf.mxu0 }
 0x10a   :  { %v118_v18 = vpop.f32.mrf.mxu1 }
 0x10b   :  { %v119_v19 = vadd.f32 %v236_v17, %v118_v18 }
 0x10d   :  { %v122_v20 = vmax.f32 %v119_v19, 0.0 }
 0x10f   :  { %v123_v21 = vpack.c.bf16 %v122_v20, %v122_v20 }
 0x111   :  { %224 = vmatmul.msk.bf16.vlgmr.msra.gmra.mxu2 %vm152_vm2, %v123_v21 }
 0x112   :  { %v120_v22 = vpop.f32.mrf.mxu1 }
 0x194   :  { %v165_v24 = vpop.f32.mrf.mxu2 }
 0x195   :  { %v166_v25 = vadd.f32 %v237_v23, %v165_v24 }
 0x197   :  { %169 = vst [vmem:[#allocation2] sm:$0xff] %v166_v25 }
 0x198   :  { %180 = dma.vmem_to_hbm [thread:$0]  %s176_s24, 128, %s178_s26, [#allocation3]  }
 0x19c   :  { %v167_v26 = vpop.f32.mrf.mxu2 }
 0x19d   :  { %262 = dma.done.wait [#allocation3], 128  }
 0x19e   :  { %263 = vsyncadd [#allocation3], 4294967168 }
 0x19f   :  { %185 = vsyncpa [#allocation3], 1 }

</bundles_post_ra>
